<compile_context>
chip_gen: v7x
topology: tpu7x:2x2x1
jax: 0.10.0
libtpu: 0.0.40
codegen_flags: <defaults>
</compile_context>

<pallas_src>
import functools

import numpy as np

import jax
import jax.numpy as jnp
from jax.experimental import pallas as pl
from jax.experimental.pallas import tpu as pltpu


def _vmem():
    return pl.BlockSpec(memory_space=pltpu.MemorySpace.VMEM)


def _level_schedule(L):
    """Static list of the (even-padded) per-batch lengths of every tree level."""
    sched = []
    Lc = L
    while Lc > 1:
        Lp = Lc + (Lc % 2)
        sched.append(Lp)
        Lc = Lp // 2
    return sched


# ---------------------------------------------------------------------------
# Single fused forward kernel.
#   x_ref   : (B*L, D)             activations (VMEM)
#   p_ref   : (rows, maxw)         packed parameter slab (VMEM, single DMA)
#   out_ref : (B, out_width)
#   buf_a/b : (scratch_rows, E)    ping-pong level buffers (VMEM scratch)
# `blocks` maps param-name -> (row_offset, rows, cols) into p_ref (static).
# ---------------------------------------------------------------------------
def _fused_forward_kernel(x_ref, p_ref, out_ref, buf_a, buf_b,
                          *, B, L, n_eq, blocks):
    f32 = jnp.float32

    def rd(name):
        off, rows, cols = blocks[name]
        return p_ref[off:off + rows, 0:cols]   # static, sublane-aligned slice

    # Load every parameter exactly once; reused across all tree levels.
    w_in = rd("w_in")
    b_in = rd("b_in")
    gamma = rd("gamma")
    beta = rd("beta")
    w0t = rd("w0_top")
    w0b = rd("w0_bot")
    b0 = rd("b0")
    eq_rest = [(rd(f"w_eq{i}"), rd(f"b_eq{i}")) for i in range(1, n_eq)]
    w_out = rd("w_out")
    b_out = rd("b_out")

    E = w0t.shape[0]

    # ---- input layer (HighOrderMLP with hidden_layers=0 -> single dense) ----
    h = jnp.dot(x_ref[...].astype(f32), w_in, preferred_element_type=f32) + b_in

    # ---- interior normalization over the embedding dim ----
    # TODO(synk): the module's `normalization` factory is unspecified in the
    # source; LayerNorm over the embedding dim is used as the stand-in.
    mean = jnp.mean(h, axis=-1, keepdims=True)
    var = jnp.mean(jnp.square(h - mean), axis=-1, keepdims=True)
    val = (h - mean) * jax.lax.rsqrt(var + 1e-5) * gamma + beta  # (B*L, E)

    def equal_apply(left, right):
        # concat([left, right], -1) @ W0 == left @ W0[:E] + right @ W0[E:]
        hh = (jnp.dot(left, w0t, preferred_element_type=f32)
              + jnp.dot(right, w0b, preferred_element_type=f32) + b0)
        for (w, b) in eq_rest:
            hh = jnp.maximum(hh, 0.0)
            hh = jnp.dot(hh, w, preferred_element_type=f32) + b
        return hh

    def store_level(dst, vals, Lc):
        # vals: (B*Lc, E), row order (b, l).  When Lc is odd a zero row is
        # prepended per batch (matches torch.cat([zeros, val], dim=1)).
        if Lc % 2 == 1:
            Lp = Lc + 1
            zero_row = jnp.zeros((1, E), f32)
            for b in range(B):
                dst[pl.ds(b * Lp, 1), :] = zero_row
                dst[pl.ds(b * Lp + 1, Lc), :] = vals[b * Lc:(b + 1) * Lc, :]
            return Lp
        dst[pl.ds(0, B * Lc), :] = vals
        return Lc

    # ---- pairwise tree reduction: statically unrolled, VMEM-resident ----
    if L > 1:
        bufs = (buf_a, buf_b)
        slot = 0
        Lp = store_level(bufs[slot], val, L)
        while Lp > 1:
            src = bufs[slot]
            npairs = (B * Lp) // 2
            left = src[pl.ds(0, npairs, stride=2), :]    # rows b*Lp + 2j
            right = src[pl.ds(1, npairs, stride=2), :]   # rows b*Lp + 2j + 1
            val = equal_apply(left, right)               # (B*Lp//2, E)
            Lc = Lp // 2
            if Lc > 1:
                slot = 1 - slot
                Lp = store_level(bufs[slot], val, Lc)
            else:
                Lp = 1

    # ---- output linear (emb -> out_width); the only HBM store ----
    out_ref[...] = (jnp.dot(val, w_out, preferred_element_type=f32)
                    + b_out).astype(out_ref.dtype)


# ---------------------------------------------------------------------------
# Deterministic parameter initialization (synthetic, no checkpoint).
# ---------------------------------------------------------------------------
def init_linear(key, fan_in, fan_out):
    kw, kb = jax.random.split(key)
    bound = 1.0 / float(fan_in) ** 0.5
    w = jax.random.uniform(kw, (fan_in, fan_out), jnp.float32, -bound, bound)
    b = jax.random.uniform(kb, (fan_out,), jnp.float32, -bound, bound)
    return w, b


def init_mlp(key, in_width, out_width, hidden_layers, hidden_width):
    # TODO(synk): HighOrderMLP with layer_type='discontinuous' (segmented
    # piecewise-polynomial basis, params n / segments) has no clean Pallas/MXU
    # mapping; a dense ReLU MLP with the same widths/layer count is used.
    if hidden_layers == 0:
        return [init_linear(key, in_width, out_width)]
    keys = jax.random.split(key, hidden_layers + 1)
    params = [init_linear(keys[0], in_width, hidden_width)]
    for i in range(1, hidden_layers):
        params.append(init_linear(keys[i], hidden_width, hidden_width))
    params.append(init_linear(keys[-1], hidden_width, out_width))
    return params


# ---------------------------------------------------------------------------
# DualConvolutionNetwork forward, fully fused into one pallas_call.
# ---------------------------------------------------------------------------
class DualConvolutionNetworkPallas:
    def __init__(self, key, in_width, out_width, embedding_dimension,
                 hidden_layers, hidden_width):
        k1, k2, k3 = jax.random.split(key, 3)
        self.emb = embedding_dimension
        self.out_width = out_width
        # input_layer: HighOrderMLP(in_width -> emb, hidden_layers=0)
        self.input_layer = init_mlp(k1, in_width, embedding_dimension, 0, 1)
        # equal_layers: HighOrderMLP(2*emb -> emb, hidden_layers, hidden_width)
        self.equal_layers = init_mlp(k2, 2 * embedding_dimension,
                                     embedding_dimension, hidden_layers,
                                     hidden_width)
        self.ln_gamma = jnp.ones((1, embedding_dimension), jnp.float32)
        self.ln_beta = jnp.zeros((1, embedding_dimension), jnp.float32)
        # output_mlp: torch.nn.Linear(emb -> out_width)
        self.output_mlp = init_linear(k3, embedding_dimension, out_width)
        self._n_eq = len(self.equal_layers)

        # ---- pack ALL parameters into one 8-row-aligned VMEM slab -------------
        # The first equal-layer weight is split into top/bottom E-row halves so
        # the kernel never needs the (-1, 2E) pairing reshape.
        E = embedding_dimension
        w_in, b_in = self.input_layer[0]
        w0, b0 = self.equal_layers[0]
        named = [("w_in", w_in), ("b_in", b_in.reshape(1, -1)),
                 ("gamma", self.ln_gamma), ("beta", self.ln_beta),
                 ("w0_top", w0[:E, :]), ("w0_bot", w0[E:, :]),
                 ("b0", b0.reshape(1, -1))]
        for i, (w, b) in enumerate(self.equal_layers[1:], start=1):
            named += [(f"w_eq{i}", w), (f"b_eq{i}", b.reshape(1, -1))]
        w_out, b_out = self.output_mlp
        named += [("w_out", w_out), ("b_out", b_out.reshape(1, -1))]

        maxw = max(int(a.shape[1]) for _, a in named)
        meta = {}
        rows = []
        off = 0
        for name, a in named:
            a = np.asarray(a, np.float32)
            r, c = a.shape
            rp = -(-r // 8) * 8                      # sublane-align each block
            blk = np.zeros((rp, maxw), np.float32)
            blk[:r, :c] = a
            meta[name] = (off, r, c)
            rows.append(blk)
            off += rp
        self._packed = jnp.asarray(np.concatenate(rows, axis=0))
        self._blocks = meta

    def __call__(self, x):
        B, L, D = x.shape
        nx = x.reshape(B * L, D)
        sched = _level_schedule(L)
        max_rows = B * (max(sched) if sched else 1)
        scratch_rows = max(8, -(-max_rows // 8) * 8)  # round up to sublane mult
        kernel = functools.partial(_fused_forward_kernel, B=B, L=L,
                                   n_eq=self._n_eq, blocks=self._blocks)
        return pl.pallas_call(
            kernel,
            out_shape=jax.ShapeDtypeStruct((B, self.out_width), jnp.float32),
            in_specs=[_vmem(), _vmem()],
            out_specs=_vmem(),
            scratch_shapes=[
                pltpu.VMEM((scratch_rows, self.emb), jnp.float32),
                pltpu.VMEM((scratch_rows, self.emb), jnp.float32),
            ],
        )(nx, self._packed)


# ---------------------------------------------------------------------------
# Pure-JAX reference (same stand-in math) for a correctness sanity check.
# ---------------------------------------------------------------------------
def _reference_forward(net, x):
    hp = jax.lax.Precision.HIGHEST
    B, L, D = x.shape
    h = x.reshape(B * L, D)
    w, b = net.input_layer[0]
    h = jnp.dot(h, w, precision=hp) + b
    mean = h.mean(-1, keepdims=True)
    var = ((h - mean) ** 2).mean(-1, keepdims=True)
    val = (h - mean) / jnp.sqrt(var + 1e-5) * net.ln_gamma + net.ln_beta
    val = val.reshape(B, L, -1)
    while val.shape[1] > 1:
        if val.shape[1] % 2 == 1:
            val = jnp.concatenate(
                [jnp.zeros((val.shape[0], 1, val.shape[2]), val.dtype), val], 1)
        vb = val.shape[0]
        h = val.reshape(-1, 2 * net.emb)
        for i, (w, b) in enumerate(net.equal_layers):
            h = jnp.dot(h, w, precision=hp) + b
            if i < len(net.equal_layers) - 1:
                h = jnp.maximum(h, 0.0)
        val = h.reshape(vb, -1, net.emb)
    val = val[:, 0, :]
    w, b = net.output_mlp
    return jnp.dot(val, w, precision=hp) + b


if __name__ == "__main__":
    key = jax.random.PRNGKey(0)
    kx, kp = jax.random.split(key)

    B, L, D = 2, 8, 4              # batch, sequence length, input width
    E, HL, HW, OUT = 32, 2, 32, 8  # embedding dim, hidden layers/width, out

    x = jax.random.normal(kx, (B, L, D), dtype=jnp.float32)
    net = DualConvolutionNetworkPallas(kp, in_width=D, out_width=OUT,
                                       embedding_dimension=E,
                                       hidden_layers=HL, hidden_width=HW)
    y = net(x)
    y = jax.block_until_ready(y)
    assert y.shape == (B, OUT) and y.dtype == jnp.float32

    y_ref = jax.block_until_ready(_reference_forward(net, x))
    assert jnp.allclose(y, y_ref, atol=1e-2, rtol=1e-2), "mismatch vs reference"
    print("KERNEL_OK")
</pallas_src>

<mosaic_0001>
module attributes {stable_mosaic.version = 11 : i64} {
  func.func @_fused_forward_kernel(%arg0: memref<16x4xf32, #tpu.memory_space<vmem>>, %arg1: memref<224x32xf32, #tpu.memory_space<vmem>>, %arg2: memref<2x8xf32, #tpu.memory_space<vmem>>, %arg3: memref<16x32xf32, #tpu.memory_space<vmem>>, %arg4: memref<16x32xf32, #tpu.memory_space<vmem>>) attributes {dimension_semantics = [], scalar_prefetch = 0 : i64, scratch_operands = 2 : i64, tpu.core_type = #tpu.core_type<tc>} {
    %c0 = arith.constant 0 : index
    %c0_0 = arith.constant 0 : index
    %0 = vector.load %arg1[%c0, %c0_0] : memref<224x32xf32, #tpu.memory_space<vmem>>, vector<4x32xf32>
    %c8 = arith.constant 8 : index
    %c0_1 = arith.constant 0 : index
    %1 = vector.load %arg1[%c8, %c0_1] : memref<224x32xf32, #tpu.memory_space<vmem>>, vector<1x32xf32>
    %c16 = arith.constant 16 : index
    %c0_2 = arith.constant 0 : index
    %2 = vector.load %arg1[%c16, %c0_2] : memref<224x32xf32, #tpu.memory_space<vmem>>, vector<1x32xf32>
    %c24 = arith.constant 24 : index
    %c0_3 = arith.constant 0 : index
    %3 = vector.load %arg1[%c24, %c0_3] : memref<224x32xf32, #tpu.memory_space<vmem>>, vector<1x32xf32>
    %c32 = arith.constant 32 : index
    %c0_4 = arith.constant 0 : index
    %4 = vector.load %arg1[%c32, %c0_4] : memref<224x32xf32, #tpu.memory_space<vmem>>, vector<32x32xf32>
    %c64 = arith.constant 64 : index
    %c0_5 = arith.constant 0 : index
    %5 = vector.load %arg1[%c64, %c0_5] : memref<224x32xf32, #tpu.memory_space<vmem>>, vector<32x32xf32>
    %c96 = arith.constant 96 : index
    %c0_6 = arith.constant 0 : index
    %6 = vector.load %arg1[%c96, %c0_6] : memref<224x32xf32, #tpu.memory_space<vmem>>, vector<1x32xf32>
    %c104 = arith.constant 104 : index
    %c0_7 = arith.constant 0 : index
    %7 = vector.load %arg1[%c104, %c0_7] : memref<224x32xf32, #tpu.memory_space<vmem>>, vector<32x32xf32>
    %c136 = arith.constant 136 : index
    %c0_8 = arith.constant 0 : index
    %8 = vector.load %arg1[%c136, %c0_8] : memref<224x32xf32, #tpu.memory_space<vmem>>, vector<1x32xf32>
    %c144 = arith.constant 144 : index
    %c0_9 = arith.constant 0 : index
    %9 = vector.load %arg1[%c144, %c0_9] : memref<224x32xf32, #tpu.memory_space<vmem>>, vector<32x32xf32>
    %c176 = arith.constant 176 : index
    %c0_10 = arith.constant 0 : index
    %10 = vector.load %arg1[%c176, %c0_10] : memref<224x32xf32, #tpu.memory_space<vmem>>, vector<1x32xf32>
    %c184 = arith.constant 184 : index
    %c0_11 = arith.constant 0 : index
    %11 = vector.load %arg1[%c184, %c0_11] : memref<224x32xf32, #tpu.memory_space<vmem>>, vector<32x8xf32>
    %c216 = arith.constant 216 : index
    %c0_12 = arith.constant 0 : index
    %12 = vector.load %arg1[%c216, %c0_12] : memref<224x32xf32, #tpu.memory_space<vmem>>, vector<1x8xf32>
    %c0_13 = arith.constant 0 : index
    %c0_14 = arith.constant 0 : index
    %13 = vector.load %arg0[%c0_13, %c0_14] : memref<16x4xf32, #tpu.memory_space<vmem>>, vector<16x4xf32>
    %cst = arith.constant dense<0.000000e+00> : vector<16x32xf32>
    %14 = tpu.matmul %13, %0, %cst {dimension_numbers = #tpu.dot_dimension_numbers<[1], [0], [0], [1], [0, 0, 1, 1], [], []>} : vector<16x4xf32>, vector<4x32xf32>, vector<16x32xf32> -> vector<16x32xf32>
    %15 = vector.broadcast %1 : vector<1x32xf32> to vector<16x32xf32>
    %16 = arith.addf %14, %15 : vector<16x32xf32>
    %cst_15 = arith.constant dense<0.000000e+00> : vector<16xf32>
    %17 = vector.multi_reduction <add>, %16, %cst_15 [1] : vector<16x32xf32> to vector<16xf32>
    %18 = vector.shape_cast %17 : vector<16xf32> to vector<16x1xf32>
    %cst_16 = arith.constant 3.200000e+01 : f32
    %19 = vector.broadcast %cst_16 : f32 to vector<16x1xf32>
    %20 = arith.divf %18, %19 : vector<16x1xf32>
    %21 = vector.broadcast %20 : vector<16x1xf32> to vector<16x32xf32>
    %22 = arith.subf %16, %21 : vector<16x32xf32>
    %23 = arith.mulf %22, %22 : vector<16x32xf32>
    %cst_17 = arith.constant dense<0.000000e+00> : vector<16xf32>
    %24 = vector.multi_reduction <add>, %23, %cst_17 [1] : vector<16x32xf32> to vector<16xf32>
    %25 = vector.shape_cast %24 : vector<16xf32> to vector<16x1xf32>
    %cst_18 = arith.constant 3.200000e+01 : f32
    %26 = vector.broadcast %cst_18 : f32 to vector<16x1xf32>
    %27 = arith.divf %25, %26 : vector<16x1xf32>
    %28 = vector.broadcast %20 : vector<16x1xf32> to vector<16x32xf32>
    %29 = arith.subf %16, %28 : vector<16x32xf32>
    %cst_19 = arith.constant 9.99999974E-6 : f32
    %30 = vector.broadcast %cst_19 : f32 to vector<16x1xf32>
    %31 = arith.addf %27, %30 : vector<16x1xf32>
    %32 = math.rsqrt %31 : vector<16x1xf32>
    %33 = vector.broadcast %32 : vector<16x1xf32> to vector<16x32xf32>
    %34 = arith.mulf %29, %33 : vector<16x32xf32>
    %35 = vector.broadcast %2 : vector<1x32xf32> to vector<16x32xf32>
    %36 = arith.mulf %34, %35 : vector<16x32xf32>
    %37 = vector.broadcast %3 : vector<1x32xf32> to vector<16x32xf32>
    %38 = arith.addf %36, %37 : vector<16x32xf32>
    %c0_20 = arith.constant 0 : index
    %c0_21 = arith.constant 0 : index
    %39 = vector.load %arg3[%c0_20, %c0_21] : memref<16x32xf32, #tpu.memory_space<vmem>>, vector<16x32xf32>
    tpu.vector_store %arg3[%c0_20, %c0_21], %38 {strides = array<i32>} : memref<16x32xf32, #tpu.memory_space<vmem>>, vector<16x32xf32>,
    %c0_22 = arith.constant 0 : index
    %c0_23 = arith.constant 0 : index
    %40 = tpu.strided_load %arg3[%c0_22, %c0_23] {strides = array<i32: 2, 1>} : memref<16x32xf32, #tpu.memory_space<vmem>>, vector<8x32xf32>
    %c1 = arith.constant 1 : index
    %c0_24 = arith.constant 0 : index
    %41 = tpu.strided_load %arg3[%c1, %c0_24] {strides = array<i32: 2, 1>} : memref<16x32xf32, #tpu.memory_space<vmem>>, vector<8x32xf32>
    %cst_25 = arith.constant dense<0.000000e+00> : vector<8x32xf32>
    %42 = tpu.matmul %40, %4, %cst_25 {dimension_numbers = #tpu.dot_dimension_numbers<[1], [0], [0], [1], [0, 0, 1, 1], [], []>} : vector<8x32xf32>, vector<32x32xf32>, vector<8x32xf32> -> vector<8x32xf32>
    %cst_26 = arith.constant dense<0.000000e+00> : vector<8x32xf32>
    %43 = tpu.matmul %41, %5, %cst_26 {dimension_numbers = #tpu.dot_dimension_numbers<[1], [0], [0], [1], [0, 0, 1, 1], [], []>} : vector<8x32xf32>, vector<32x32xf32>, vector<8x32xf32> -> vector<8x32xf32>
    %44 = arith.addf %42, %43 : vector<8x32xf32>
    %45 = vector.broadcast %6 : vector<1x32xf32> to vector<8x32xf32>
    %46 = arith.addf %44, %45 : vector<8x32xf32>
    %cst_27 = arith.constant 0.000000e+00 : f32
    %47 = vector.broadcast %cst_27 : f32 to vector<8x32xf32>
    %48 = arith.maximumf %46, %47 : vector<8x32xf32>
    %cst_28 = arith.constant dense<0.000000e+00> : vector<8x32xf32>
    %49 = tpu.matmul %48, %7, %cst_28 {dimension_numbers = #tpu.dot_dimension_numbers<[1], [0], [0], [1], [0, 0, 1, 1], [], []>} : vector<8x32xf32>, vector<32x32xf32>, vector<8x32xf32> -> vector<8x32xf32>
    %50 = vector.broadcast %8 : vector<1x32xf32> to vector<8x32xf32>
    %51 = arith.addf %49, %50 : vector<8x32xf32>
    %cst_29 = arith.constant 0.000000e+00 : f32
    %52 = vector.broadcast %cst_29 : f32 to vector<8x32xf32>
    %53 = arith.maximumf %51, %52 : vector<8x32xf32>
    %cst_30 = arith.constant dense<0.000000e+00> : vector<8x32xf32>
    %54 = tpu.matmul %53, %9, %cst_30 {dimension_numbers = #tpu.dot_dimension_numbers<[1], [0], [0], [1], [0, 0, 1, 1], [], []>} : vector<8x32xf32>, vector<32x32xf32>, vector<8x32xf32> -> vector<8x32xf32>
    %55 = vector.broadcast %10 : vector<1x32xf32> to vector<8x32xf32>
    %56 = arith.addf %54, %55 : vector<8x32xf32>
    %c0_31 = arith.constant 0 : index
    %c0_32 = arith.constant 0 : index
    %57 = vector.load %arg4[%c0_31, %c0_32] : memref<16x32xf32, #tpu.memory_space<vmem>>, vector<8x32xf32>
    tpu.vector_store %arg4[%c0_31, %c0_32], %56 {strides = array<i32>} : memref<16x32xf32, #tpu.memory_space<vmem>>, vector<8x32xf32>,
    %c0_33 = arith.constant 0 : index
    %c0_34 = arith.constant 0 : index
    %58 = tpu.strided_load %arg4[%c0_33, %c0_34] {strides = array<i32: 2, 1>} : memref<16x32xf32, #tpu.memory_space<vmem>>, vector<4x32xf32>
    %c1_35 = arith.constant 1 : index
    %c0_36 = arith.constant 0 : index
    %59 = tpu.strided_load %arg4[%c1_35, %c0_36] {strides = array<i32: 2, 1>} : memref<16x32xf32, #tpu.memory_space<vmem>>, vector<4x32xf32>
    %cst_37 = arith.constant dense<0.000000e+00> : vector<4x32xf32>
    %60 = tpu.matmul %58, %4, %cst_37 {dimension_numbers = #tpu.dot_dimension_numbers<[1], [0], [0], [1], [0, 0, 1, 1], [], []>} : vector<4x32xf32>, vector<32x32xf32>, vector<4x32xf32> -> vector<4x32xf32>
    %cst_38 = arith.constant dense<0.000000e+00> : vector<4x32xf32>
    %61 = tpu.matmul %59, %5, %cst_38 {dimension_numbers = #tpu.dot_dimension_numbers<[1], [0], [0], [1], [0, 0, 1, 1], [], []>} : vector<4x32xf32>, vector<32x32xf32>, vector<4x32xf32> -> vector<4x32xf32>
    %62 = arith.addf %60, %61 : vector<4x32xf32>
    %63 = vector.broadcast %6 : vector<1x32xf32> to vector<4x32xf32>
    %64 = arith.addf %62, %63 : vector<4x32xf32>
    %cst_39 = arith.constant 0.000000e+00 : f32
    %65 = vector.broadcast %cst_39 : f32 to vector<4x32xf32>
    %66 = arith.maximumf %64, %65 : vector<4x32xf32>
    %cst_40 = arith.constant dense<0.000000e+00> : vector<4x32xf32>
    %67 = tpu.matmul %66, %7, %cst_40 {dimension_numbers = #tpu.dot_dimension_numbers<[1], [0], [0], [1], [0, 0, 1, 1], [], []>} : vector<4x32xf32>, vector<32x32xf32>, vector<4x32xf32> -> vector<4x32xf32>
    %68 = vector.broadcast %8 : vector<1x32xf32> to vector<4x32xf32>
    %69 = arith.addf %67, %68 : vector<4x32xf32>
    %cst_41 = arith.constant 0.000000e+00 : f32
    %70 = vector.broadcast %cst_41 : f32 to vector<4x32xf32>
    %71 = arith.maximumf %69, %70 : vector<4x32xf32>
    %cst_42 = arith.constant dense<0.000000e+00> : vector<4x32xf32>
    %72 = tpu.matmul %71, %9, %cst_42 {dimension_numbers = #tpu.dot_dimension_numbers<[1], [0], [0], [1], [0, 0, 1, 1], [], []>} : vector<4x32xf32>, vector<32x32xf32>, vector<4x32xf32> -> vector<4x32xf32>
    %73 = vector.broadcast %10 : vector<1x32xf32> to vector<4x32xf32>
    %74 = arith.addf %72, %73 : vector<4x32xf32>
    %c0_43 = arith.constant 0 : index
    %c0_44 = arith.constant 0 : index
    %75 = vector.load %arg3[%c0_43, %c0_44] : memref<16x32xf32, #tpu.memory_space<vmem>>, vector<4x32xf32>
    tpu.vector_store %arg3[%c0_43, %c0_44], %74 {strides = array<i32>} : memref<16x32xf32, #tpu.memory_space<vmem>>, vector<4x32xf32>,
    %c0_45 = arith.constant 0 : index
    %c0_46 = arith.constant 0 : index
    %76 = tpu.strided_load %arg3[%c0_45, %c0_46] {strides = array<i32: 2, 1>} : memref<16x32xf32, #tpu.memory_space<vmem>>, vector<2x32xf32>
    %c1_47 = arith.constant 1 : index
    %c0_48 = arith.constant 0 : index
    %77 = tpu.strided_load %arg3[%c1_47, %c0_48] {strides = array<i32: 2, 1>} : memref<16x32xf32, #tpu.memory_space<vmem>>, vector<2x32xf32>
    %cst_49 = arith.constant dense<0.000000e+00> : vector<2x32xf32>
    %78 = tpu.matmul %76, %4, %cst_49 {dimension_numbers = #tpu.dot_dimension_numbers<[1], [0], [0], [1], [0, 0, 1, 1], [], []>} : vector<2x32xf32>, vector<32x32xf32>, vector<2x32xf32> -> vector<2x32xf32>
    %cst_50 = arith.constant dense<0.000000e+00> : vector<2x32xf32>
    %79 = tpu.matmul %77, %5, %cst_50 {dimension_numbers = #tpu.dot_dimension_numbers<[1], [0], [0], [1], [0, 0, 1, 1], [], []>} : vector<2x32xf32>, vector<32x32xf32>, vector<2x32xf32> -> vector<2x32xf32>
    %80 = arith.addf %78, %79 : vector<2x32xf32>
    %81 = vector.broadcast %6 : vector<1x32xf32> to vector<2x32xf32>
    %82 = arith.addf %80, %81 : vector<2x32xf32>
    %cst_51 = arith.constant 0.000000e+00 : f32
    %83 = vector.broadcast %cst_51 : f32 to vector<2x32xf32>
    %84 = arith.maximumf %82, %83 : vector<2x32xf32>
    %cst_52 = arith.constant dense<0.000000e+00> : vector<2x32xf32>
    %85 = tpu.matmul %84, %7, %cst_52 {dimension_numbers = #tpu.dot_dimension_numbers<[1], [0], [0], [1], [0, 0, 1, 1], [], []>} : vector<2x32xf32>, vector<32x32xf32>, vector<2x32xf32> -> vector<2x32xf32>
    %86 = vector.broadcast %8 : vector<1x32xf32> to vector<2x32xf32>
    %87 = arith.addf %85, %86 : vector<2x32xf32>
    %cst_53 = arith.constant 0.000000e+00 : f32
    %88 = vector.broadcast %cst_53 : f32 to vector<2x32xf32>
    %89 = arith.maximumf %87, %88 : vector<2x32xf32>
    %cst_54 = arith.constant dense<0.000000e+00> : vector<2x32xf32>
    %90 = tpu.matmul %89, %9, %cst_54 {dimension_numbers = #tpu.dot_dimension_numbers<[1], [0], [0], [1], [0, 0, 1, 1], [], []>} : vector<2x32xf32>, vector<32x32xf32>, vector<2x32xf32> -> vector<2x32xf32>
    %91 = vector.broadcast %10 : vector<1x32xf32> to vector<2x32xf32>
    %92 = arith.addf %90, %91 : vector<2x32xf32>
    %cst_55 = arith.constant dense<0.000000e+00> : vector<2x8xf32>
    %93 = tpu.matmul %92, %11, %cst_55 {dimension_numbers = #tpu.dot_dimension_numbers<[1], [0], [0], [1], [0, 0, 1, 1], [], []>} : vector<2x32xf32>, vector<32x8xf32>, vector<2x8xf32> -> vector<2x8xf32>
    %94 = vector.broadcast %12 : vector<1x8xf32> to vector<2x8xf32>
    %95 = arith.addf %93, %94 : vector<2x8xf32>
    %c0_56 = arith.constant 0 : index
    %c0_57 = arith.constant 0 : index
    %96 = vector.load %arg2[%c0_56, %c0_57] : memref<2x8xf32, #tpu.memory_space<vmem>>, vector<2x8xf32>
    tpu.vector_store %arg2[%c0_56, %c0_57], %95 {strides = array<i32>} : memref<2x8xf32, #tpu.memory_space<vmem>>, vector<2x8xf32>,
    return
  }
}

</mosaic_0001>

<bundles_post_ra>
// kernel: tpu_custom_call.1
= control target key start
LH: loop header
LB: loop body
LE: loop exit
PB: predicated region body
PF: predicated region fallthrough
CT: control target
= control target key end

     0   :  { %vm53_vm0 = vcmask 1043456   ;;  %vm46_vm1 = vcmask 31744   ;;  %s1772_s0 = inlined_call_operand.vmem [shape: f32[16,4], index: 0, kind: input, shape index: {}]   ;;  %s1773_s1 = inlined_call_operand.vmem [shape: f32[224,32], index: 1, kind: input, shape index: {}]   ;;  %s1774_s2 = inlined_call_operand.hbm [shape: f32[2,8], index: 2, kind: output, shape index: {}]  }
   0x1   :  { %v12_v0 = vld [vmem:[%s1773_s1] sm:$0xf]  ;;  %v41_v2 = vld [vmem:[%s1772_s0 + $0x8] sm:$0xff] }
   0x2   :  { %v40_v1 = vld [vmem:[%s1772_s0] sm:$0xff]  ;;  %1266 = vmatprep.subr.msk.mxu0 %vm53_vm0, %v12_v0 }
   0x3   :  { %1268 = vmatprep.mubr.msk.f32.mxu0 %vm46_vm1, %v40_v1 }
   0x4   :  { %7 = vsyncpa [#allocation5], 0  ;;  %1267 = vmatpush3.msk.msra.mxu0 %vm53_vm0, %v12_v0  ;;  %v1175_v3 = vld [vmem:[%s1773_s1 + $0x8] ss:$0 sm:$0xff]  ;;  %vm132_vm2 = vcmask 261120   ;;  %v20_v20 = vld [vmem:[%s1773_s1 + $0x40] sm:$0xff] }
   0x5   :  { %1269 = vmatmul.mubr.msk.f32.vlgmr.msra.gmra.mrb[0].mxu0 %vm46_vm1, %v41_v2  ;;  %v21_v21 = vld [vmem:[%s1773_s1 + $0x48] sm:$0xff]  ;;  %v16_v22 = vld [vmem:[%s1773_s1 + $0x20] sm:$0xff]  ;;  %v1524_v25 = vmov 0.0|0.0   ;;  %v22_v27 = vld [vmem:[%s1773_s1 + $0x50] sm:$0xff]  ;;  %vm1525_vm3 = vmmov 0   ;;  %v1526_v32 = vmov 0.0  }
   0x6   :  { %v1568_v23 = vpack.c.bf16 %v21_v21, %v20_v20  ;;  %v17_v24 = vld [vmem:[%s1773_s1 + $0x28] sm:$0xff]  ;;  %1414 = vmatprep.subr.bf16.mxu1 %v1524_v25  ;;  %1420 = vmatprep.subr.bf16.mxu0 %v1524_v25  ;;  %v23_v28 = vld [vmem:[%s1773_s1 + $0x58] sm:$0xff]  ;;  %v18_v29 = vld [vmem:[%s1773_s1 + $0x30] sm:$0xff]  ;;  %vm783_vm4 = vcmask 257024   ;;  %s1527_s11 = smov [#allocation4]   ;;  %vm1159_vm5 = vcmask 58368  }
   0x7   :  { %v1575_v26 = vpack.c.bf16 %v17_v24, %v16_v22  ;;  %v1587_v30 = vpack.c.bf16 %v23_v28, %v22_v27  ;;  %v19_v31 = vld [vmem:[%s1773_s1 + $0x38] sm:$0xff]  ;;  %1279 = vmatprep.mubr.msk.f32.mxu1 %vm1525_vm3, %v1526_v32  ;;  %1290 = vmatprep.mubr.msk.f32.mxu0 %vm1525_vm3, %v1526_v32  ;;  %v1179_v41 = vld [vmem:[%s1773_s1 + $0x10] ss:$0 sm:$0xff]  ;;  %v25_v52 = vld [vmem:[%s1773_s1 + $0x68] sm:$0xff]  ;;  %s1167_s12 = sshll.u32 %s1527_s11, 4  ;;  %s1168_s12 = int_to_ptr.vmem [resolvable:$true] %s1167_s12 }
   0x8   :  { %1416 = vmatpush3.bf16.msra.mxu1 %v1568_v23  ;;  %v1596_v33 = vpack.c.bf16 %v19_v31, %v18_v29  ;;  %v1180_v43 = vld [vmem:[%s1773_s1 + $0x18] ss:$0 sm:$0xff]  ;;  %v26_v53 = vld [vmem:[%s1773_s1 + $0x70] sm:$0xff]  ;;  %v28_v56 = vld [vmem:[%s1773_s1 + $0x80] sm:$0xff]  ;;  %s1500_s13 = scalar_lea.vmem %s1168_s12, 32  ;;  %p1505_p1 = scmp.lt.s32.totalorder %s1168_s12, %s1168_s12 }
   0x9   :  { %1422 = vmatpush3.bf16.msra.mxu0 %v1575_v26  ;;  %1417 = vmatprep.subr.bf16.mxu1 %v1524_v25  ;;  %v1625_v54 = vpack.c.bf16 %v26_v53, %v25_v52  ;;  %v27_v55 = vld [vmem:[%s1773_s1 + $0x78] sm:$0xff]  ;;  %v30_v58 = vld [vmem:[%s1773_s1 + $0x90] sm:$0xff]  ;;  %v1652_v62 = vld [vmem:[%s1773_s1 + $0x60] ss:$0 sm:$0xff]  ;;  %p1501_p0 = scmp.ne.s32.totalorder %s1168_s12, %s1500_s13  ;;  %p1506_p2 = scmp.lt.s32.totalorder %s1500_s13, %s1500_s13 }
   0xa   :  { %1423 = vmatprep.subr.bf16.mxu0 %v1524_v25  ;;  %v1635_v57 = vpack.c.bf16 %v28_v56, %v27_v55  ;;  %v31_v59 = vld [vmem:[%s1773_s1 + $0x98] sm:$0xff] }
   0xb   :  { %v1645_v60 = vpack.c.bf16 %v31_v59, %v30_v58  ;;  %v1196_v55 = vld [vmem:[%s1773_s1 + $0xd8] ss:$0 sm:$0xff]  ;;  %p1507_p3 = por %p1506_p2, %p1505_p1 }
   0xc   :  { %1419 = vmatpush3.bf16.msra.mxu1 %v1587_v30 }
   0xd   :  { %1425 = vmatpush3.bf16.msra.mxu0 %v1596_v33  ;;  %1426 = vmatprep.subr.bf16.mxu1 %v1524_v25  ;;  %p1508_p4 = pnand %p1507_p3, %p1501_p0 }
   0xe   :  { %1432 = vmatprep.subr.bf16.mxu0 %v1524_v25 }
  0xd8   :  { %v1270_v4 = vpop.f32.mrb[0].mxu0 }
  0xd9   :  { %v123_v5 = vpop.f32.mrb[1].mxu0  ;;  %v129_v7 = vadd.f32 %v1270_v4, %v1175_v3 }
  0xda   :  { %v124_v6 = vadd.f32 %v1175_v3, %v123_v5  ;;  %v32_v5 = vld [vmem:[%s1773_s1 + $0xa0] sm:$0xff] }
  0xdb   :  { %v136_v9 = vsel %vm132_vm2, %v129_v7, 0.0 }
  0xdc   :  { %v133_v8 = vsel %vm132_vm2, %v124_v6, 0.0 }
  0xdd   :  { %134 = vadd.xlane.f32.xlu0 %v133_v8  ;;  %v1675_v8 = vld [vmem:[%s1773_s1 + $0x88] ss:$0 sm:$0xff] }
  0xe1   :  { %137 = vadd.xlane.f32.xlu0 %v136_v9 }
 0x16a   :  { %v135_v10 = vpop.xlane.xlu0 %134 }
 0x16b   :  { %v140_v11 = vmul.f32 0.03125, %v135_v10 }
 0x16d   :  { %v142_v12 = vsub.f32 %v124_v6, %v140_v11  ;;  %v33_v6 = vld [vmem:[%s1773_s1 + $0xa8] sm:$0xff] }
 0x16e   :  { %v138_v13 = vpop.xlane.xlu0 %137 }
 0x16f   :  { %v141_v14 = vmul.f32 0.03125, %v138_v13  ;;  %v144_v15 = vmul.f32 %v142_v12, %v142_v12  ;;  %v1688_v13 = vld [vmem:[%s1773_s1 + $0xb0] ss:$0 sm:$0xff] }
 0x171   :  { %v143_v16 = vsub.f32 %v129_v7, %v141_v14  ;;  %v146_v17 = vsel %vm132_vm2, %v144_v15, 0.0  ;;  %v1668_v7 = vpack.c.bf16 %v33_v6, %v32_v5 }
 0x172   :  { %147 = vadd.xlane.f32.xlu1 %v146_v17 }
 0x173   :  { %v145_v18 = vmul.f32 %v143_v16, %v143_v16 }
 0x175   :  { %v149_v19 = vsel %vm132_vm2, %v145_v18, 0.0 }
 0x176   :  { %150 = vadd.xlane.f32.xlu1 %v149_v19 }
 0x1ff   :  { %v148_v34 = vpop.xlane.xlu1 %147 }
 0x200   :  { %v152_v35 = vmul.f32 0.03125, %v148_v34 }
 0x202   :  { %v154_v36 = vadd.f32 1e-05, %v152_v35 }
 0x203   :  { %v151_v37 = vpop.xlane.xlu1 %150 }
 0x204   :  { %1496 = vrsqrt.f32 %v154_v36  ;;  %v153_v38 = vmul.f32 0.03125, %v151_v37 }
 0x206   :  { %v155_v39 = vadd.f32 1e-05, %v153_v38 }
 0x208   :  { %1498 = vrsqrt.f32 %v155_v39 }
 0x20e   :  { %v1497_v40 = vpop.eup %1496 }
 0x20f   :  { %v158_v42 = vmul.f32 %v1497_v40, %v142_v12 }
 0x211   :  { %v164_v44 = vmul.f32 %v1179_v41, %v158_v42 }
 0x212   :  { %v1499_v45 = vpop.eup %1498 }
 0x213   :  { %v170_v46 = vadd.f32 %v1180_v43, %v164_v44  ;;  %v159_v47 = vmul.f32 %v1499_v45, %v143_v16  ;;  %v35_v44 = vld [vmem:[%s1773_s1 + $0xb8] sm:$0xff]  ;;  %v36_v45 = vld [vmem:[%s1773_s1 + $0xc0] sm:$0xff] }
 0x215   :  { %172 = vst.msk [vmem:[#allocation2] sm:$0xff] %vm132_vm2, %v170_v46  ;;  %v165_v48 = vmul.f32 %v1179_v41, %v159_v47  ;;  %v1487_v46 = vpack.c.bf16 %v36_v45, %v35_v44 }
 0x217   :  { %v171_v49 = vadd.f32 %v1180_v43, %v165_v48 }
 0x219   :  { %173 = vst.msk [vmem:[#allocation2 + $0x8] sm:$0xff] %vm132_vm2, %v171_v49 }
 0x220   :  { %v176_v50 = vld [vmem:[#allocation2 + $0x1] ss:$2 sm:$0xff]  ;;  %v174_v51 = vld [vmem:[#allocation2] ss:$2 sm:$0xff] }
 0x221   :  { %1280 = vmatmul.mubr.msk.f32.vlgmr.msra.gmra.mrb[0].mxu1 %vm132_vm2, %v176_v50  ;;  %1291 = vmatmul.mubr.msk.f32.vlgmr.msra.gmra.mrb[2].mxu0 %vm132_vm2, %v174_v51  ;;  %v38_v51 = vld [vmem:[%s1773_s1 + $0xd0] sm:$0xff] }
 0x222   :  { %1301 = vmatprep.mubr.msk.f32.mxu1 %vm1525_vm3, %v1526_v32  ;;  %1312 = vmatprep.mubr.msk.f32.mxu0 %vm1525_vm3, %v1526_v32 }
 0x223   :  { %1428 = vmatpush3.bf16.msra.mxu1 %v1625_v54  ;;  %1434 = vmatpush3.bf16.msra.mxu0 %v1645_v60 }
 0x224   :  { %1429 = vmatprep.subr.bf16.mxu1 %v1524_v25  ;;  %1435 = vmatprep.subr.bf16.mxu0 %v1524_v25 }
 0x227   :  { %1431 = vmatpush3.bf16.msra.mxu1 %v1635_v57  ;;  %1437 = vmatpush3.bf16.msra.mxu0 %v1668_v7 }
 0x228   :  { %1438 = vmatprep.subr.bf16.mxu1 %v1524_v25  ;;  %1444 = vmatprep.subr.bf16.mxu0 %v1524_v25 }
 0x2f4   :  { %v246_v61 = vpop.f32.mrb[0].mxu1  ;;  %v319_v63 = vpop.f32.mrb[2].mxu0 }
 0x2f5   :  { %v320_v0 = vadd.f32 %v319_v63, %v246_v61  ;;  %v1281_v1 = vpop.f32.mrb[1].mxu1  ;;  %v1292_v2 = vpop.f32.mrb[3].mxu0 }
 0x2f7   :  { %v327_v3 = vadd.f32 %v1652_v62, %v320_v0 }
 0x2f9   :  { %v328_v4 = vmax.f32 %v327_v3, 0.0 }
 0x2fb   :  { %1302 = vmatmul.mubr.msk.f32.vlgmr.msra.gmra.mrb[2].mxu1 %vm132_vm2, %v328_v4 }
 0x2fc   :  { %1440 = vmatpush3.bf16.msra.mxu1 %v1568_v23  ;;  %1323 = vmatprep.mubr.msk.f32.mxu1 %vm1525_vm3, %v1526_v32 }
 0x2fd   :  { %1441 = vmatprep.subr.bf16.mxu1 %v1524_v25 }
 0x300   :  { %1443 = vmatpush3.bf16.msra.mxu1 %v1587_v30 }
 0x301   :  { %1450 = vmatprep.subr.bf16.mxu1 %v1524_v25 }
 0x3ce   :  { %v402_v9 = vpop.f32.mrb[2].mxu1 }
 0x3cf   :  { %v403_v10 = vadd.f32 %v1675_v8, %v402_v9  ;;  %v1303_v11 = vpop.f32.mrb[3].mxu1 }
 0x3d1   :  { %v406_v12 = vmax.f32 %v403_v10, 0.0 }
 0x3d3   :  { %1313 = vmatmul.mubr.msk.f32.vlgmr.msra.gmra.mrb[4].mxu0 %vm132_vm2, %v406_v12 }
 0x3d4   :  { %1446 = vmatpush3.bf16.msra.mxu0 %v1575_v26  ;;  %1334 = vmatprep.mubr.msk.f32.mxu0 %vm1525_vm3, %v1526_v32 }
 0x3d5   :  { %1447 = vmatprep.subr.bf16.mxu0 %v1524_v25 }
 0x3d8   :  { %1449 = vmatpush3.bf16.msra.mxu0 %v1596_v33 }
 0x3d9   :  { %1456 = vmatprep.subr.bf16.mxu0 %v1524_v25 }
 0x4a6   :  { %v480_v14 = vpop.f32.mrb[4].mxu0 }
 0x4a7   :  { %v481_v15 = vadd.f32 %v1688_v13, %v480_v14  ;;  %v1314_v16 = vpop.f32.mrb[5].mxu0 }
 0x4a9   :  { %484 = vst.msk [vmem:[#allocation3] sm:$0xff] %vm132_vm2, %v481_v15 }
 0x4b0   :  { %v487_v17 = vld [vmem:[#allocation3 + $0x1] ss:$2 sm:$0xf]  ;;  %v485_v18 = vld [vmem:[#allocation3] ss:$2 sm:$0xf] }
 0x4b1   :  { %1324 = vmatmul.mubr.msk.f32.vlgmr.msra.gmra.mrb[4].mxu1 %vm132_vm2, %v487_v17  ;;  %1335 = vmatmul.mubr.msk.f32.vlgmr.msra.gmra.mrb[6].mxu0 %vm132_vm2, %v485_v18 }
 0x4b2   :  { %1452 = vmatpush3.bf16.msra.mxu1 %v1625_v54  ;;  %1345 = vmatprep.mubr.msk.f32.mxu1 %vm1525_vm3, %v1526_v32 }
 0x4b3   :  { %1453 = vmatprep.subr.bf16.mxu1 %v1524_v25  ;;  %1458 = vmatpush3.bf16.msra.mxu0 %v1645_v60 }
 0x4b4   :  { %1459 = vmatprep.subr.bf16.mxu0 %v1524_v25  ;;  %1356 = vmatprep.mubr.msk.f32.mxu0 %vm1525_vm3, %v1526_v32 }
 0x4b6   :  { %1455 = vmatpush3.bf16.msra.mxu1 %v1635_v57 }
 0x4b7   :  { %1461 = vmatpush3.bf16.msra.mxu0 %v1668_v7  ;;  %1462 = vmatprep.subr.bf16.mxu1 %v1524_v25 }
 0x4b8   :  { %1468 = vmatprep.subr.bf16.mxu0 %v1524_v25 }
 0x584   :  { %v557_v19 = vpop.f32.mrb[4].mxu1  ;;  %v630_v20 = vpop.f32.mrb[6].mxu0 }
 0x585   :  { %v631_v21 = vadd.f32 %v630_v20, %v557_v19  ;;  %v1325_v22 = vpop.f32.mrb[5].mxu1  ;;  %v1336_v24 = vpop.f32.mrb[7].mxu0 }
 0x587   :  { %v634_v27 = vadd.f32 %v1652_v62, %v631_v21 }
 0x589   :  { %v635_v28 = vmax.f32 %v634_v27, 0.0 }
 0x58b   :  { %1346 = vmatmul.mubr.msk.f32.vlgmr.msra.gmra.mrb[6].mxu1 %vm132_vm2, %v635_v28 }
 0x58c   :  { %1464 = vmatpush3.bf16.msra.mxu1 %v1568_v23  ;;  %1367 = vmatprep.mubr.msk.f32.mxu1 %vm1525_vm3, %v1526_v32 }
 0x58d   :  { %1465 = vmatprep.subr.bf16.mxu1 %v1524_v25 }
 0x590   :  { %1467 = vmatpush3.bf16.msra.mxu1 %v1587_v30 }
 0x591   :  { %1474 = vmatprep.subr.bf16.mxu1 %v1524_v25 }
 0x65e   :  { %v705_v29 = vpop.f32.mrb[6].mxu1 }
 0x65f   :  { %v706_v31 = vadd.f32 %v1675_v8, %v705_v29  ;;  %v1347_v34 = vpop.f32.mrb[7].mxu1 }
 0x661   :  { %v709_v35 = vmax.f32 %v706_v31, 0.0 }
 0x663   :  { %1357 = vmatmul.mubr.msk.f32.vlgmr.msra.gmra.mrb[8].mxu0 %vm132_vm2, %v709_v35 }
 0x664   :  { %1470 = vmatpush3.bf16.msra.mxu0 %v1575_v26  ;;  %1378 = vmatprep.mubr.msk.f32.mxu0 %vm1525_vm3, %v1526_v32 }
 0x665   :  { %1471 = vmatprep.subr.bf16.mxu0 %v1524_v25 }
 0x668   :  { %1473 = vmatpush3.bf16.msra.mxu0 %v1596_v33 }
 0x669   :  { %1480 = vmatprep.subr.bf16.mxu0 %v1524_v25 }
 0x736   :  { %v779_v23 = vpop.f32.mrb[8].mxu0 }
 0x737   :  { %v780_v30 = vadd.f32 %v1688_v13, %v779_v23  ;;  %v1358_v36 = vpop.f32.mrb[9].mxu0 }
 0x739   :  { %784 = vst.msk [vmem:[#allocation2] sm:$0xf] %vm783_vm4, %v780_v30 }
 0x740   :  { %v786_v37 = vld [vmem:[#allocation2 + $0x1] ss:$2 sm:$0x3]  ;;  %v785_v38 = vld [vmem:[#allocation2] ss:$2 sm:$0x3] }
 0x741   :  { %1368 = vmatmul.mubr.msk.f32.vlgmr.msra.gmra.mrb[8].mxu1 %vm132_vm2, %v786_v37  ;;  %1379 = vmatmul.mubr.msk.f32.vlgmr.msra.gmra.mrb[10].mxu0 %vm132_vm2, %v785_v38 }
 0x742   :  { %1476 = vmatpush3.bf16.msra.mxu1 %v1625_v54  ;;  %1389 = vmatprep.mubr.msk.f32.mxu1 %vm1525_vm3, %v1526_v32 }
 0x743   :  { %1477 = vmatprep.subr.bf16.mxu1 %v1524_v25  ;;  %1482 = vmatpush3.bf16.msra.mxu0 %v1645_v60 }
 0x744   :  { %1483 = vmatprep.subr.bf16.mxu0 %v1524_v25  ;;  %1400 = vmatprep.mubr.msk.f32.mxu0 %vm1525_vm3, %v1526_v32 }
 0x746   :  { %1479 = vmatpush3.bf16.msra.mxu1 %v1635_v57 }
 0x747   :  { %1485 = vmatpush3.bf16.msra.mxu0 %v1668_v7  ;;  %1486 = vmatprep.subr.bf16.mxu1 %v1524_v25 }
 0x814   :  { %v856_v26 = vpop.f32.mrb[8].mxu1  ;;  %v929_v33 = vpop.f32.mrb[10].mxu0 }
 0x815   :  { %v930_v39 = vadd.f32 %v929_v33, %v856_v26  ;;  %v1369_v40 = vpop.f32.mrb[9].mxu1  ;;  %v1380_v41 = vpop.f32.mrb[11].mxu0 }
 0x817   :  { %v933_v42 = vadd.f32 %v1652_v62, %v930_v39 }
 0x819   :  { %v934_v43 = vmax.f32 %v933_v42, 0.0 }
 0x81b   :  { %1390 = vmatmul.mubr.msk.f32.vlgmr.msra.gmra.mrb[10].mxu1 %vm132_vm2, %v934_v43 }
 0x81c   :  { %1411 = vmatprep.mubr.msk.f32.mxu1 %vm1525_vm3, %v1526_v32  ;;  %1488 = vmatpush3.bf16.msra.mxu1 %v1487_v46  ;;  %v37_v32 = vld [vmem:[%s1773_s1 + $0xc8] sm:$0xff] }
 0x81d   :  { %1489 = vmatprep.subr.bf16.mxu1 %v1524_v25  ;;  %v1490_v52 = vpack.c.bf16 %v38_v51, %v37_v32 }
 0x820   :  { %1491 = vmatpush3.bf16.msra.mxu1 %v1490_v52 }
 0x8ee   :  { %v1004_v47 = vpop.f32.mrb[10].mxu1 }
 0x8ef   :  { %v1005_v48 = vadd.f32 %v1675_v8, %v1004_v47  ;;  %v1391_v49 = vpop.f32.mrb[11].mxu1 }
 0x8f1   :  { %v1008_v50 = vmax.f32 %v1005_v48, 0.0 }
 0x8f3   :  { %1401 = vmatmul.mubr.msk.f32.vlgmr.msra.gmra.mrb[12].mxu0 %vm132_vm2, %v1008_v50 }
 0x9c6   :  { %v1078_v53 = vpop.f32.mrb[12].mxu0 }
 0x9c7   :  { %v1079_v25 = vadd.f32 %v1688_v13, %v1078_v53  ;;  %v1402_v54 = vpop.f32.mrb[13].mxu0 }
 0x9c9   :  { %1412 = vmatmul.mubr.msk.f32.vlgmr.msra.gmra.mrb[12].mxu1 %vm132_vm2, %v1079_v25 }
 0xa9c   :  { %v1155_v56 = vpop.f32.mrb[12].mxu1 }
 0xa9d   :  { %v1156_v57 = vadd.f32 %v1196_v55, %v1155_v56  ;;  %v1413_v58 = vpop.f32.mrb[13].mxu1 }
 0xa9f   :  { %1160 = vst.msk [vmem:[#allocation4] sm:$0x3] %vm1159_vm5, %v1156_v57 }
 0xaa0   :  { %1511 = shalt.err (!%p1508_p4)
}
 0xaa1   :  { %s1512_s16 = scalar_lea.hbm %s1774_s2, 32 }
 0xaa2   :  { %p1513_p5 = scmp.ne.s32.totalorder %s1774_s2, %s1512_s16  ;;  %p1516_p6 = scmp.lt.u32.totalorder %s1512_s16, %s1774_s2 }
 0xaa4   :  { %p1518_p7 = pnand %p1516_p6, %p1513_p5 }
 0xaa6   :  { %1521 = shalt.err (!%p1518_p7)
}
 0xaa7   :  { %1170 = dma.vmem_to_hbm [thread:$0]  %s1168_s12, 32, %s1774_s2, [#allocation5]  }
 0xaa8   :  { %1522 = dma.done.wait [#allocation5], 32  }
 0xaa9   :  { %1523 = vsyncadd [#allocation5], 4294967264 }
 0xaaa   :  { %1174 = vsyncpa [#allocation5], 1 }

</bundles_post_ra>
